<compile_context>
chip_gen: v7x
topology: tpu7x:2x2x1
jax: 0.10.0
libtpu: 0.0.40
codegen_flags: <defaults>
</compile_context>

<pallas_src>
import jax
import jax.numpy as jnp
from jax import lax
from jax.experimental import pallas as pl
from jax.experimental.pallas import tpu as pltpu


def _round_up(n, m):
    return -(-n // m) * m


def _fc_tile(x_eff, w_ref, b_ref, o_ref):
    # x_eff: (tb, in_ch); w_ref: (out_ch, in_ch); b_ref: (1, out_ch)
    y = lax.dot_general(
        x_eff, w_ref[...],
        dimension_numbers=(((1,), (1,)), ((), ())),   # contract in_ch with in_ch
        preferred_element_type=jnp.float32)
    o_ref[...] = (y + b_ref[...]).astype(o_ref.dtype)


def _msd_fc_train_kernel(x_ref, scale_ref, w_ref, b_ref, o_ref):
    """Training: x is pre-scaled by the averaged dropout keep-count."""
    _fc_tile(x_ref[...] * scale_ref[...], w_ref, b_ref, o_ref)


def _msd_fc_eval_kernel(x_ref, w_ref, b_ref, o_ref):
    """Eval / p=0: dropout is the identity, every sample is fc(x)."""
    _fc_tile(x_ref[...], w_ref, b_ref, o_ref)


def multi_sample_dropout_fc(x, weight, bias, *, key=None, num_sample=5,
                            dropout=0.5, training=True, block_b=256):
    """x: (B, in_ch); weight: (out_ch, in_ch) [PyTorch layout]; bias: (out_ch,)."""
    B, in_ch = x.shape
    out_ch, in_ch_w = weight.shape
    assert in_ch == in_ch_w
    assert 0.0 <= dropout < 1.0
    keep_prob = 1.0 - dropout

    # Batch tile: as large as requested (default 256 fills the 2x256 MXU on
    # v6e/v7x; pass 128 on v5e), clamped so tiny batches use a single tile.
    tb = min(_round_up(max(block_b, 8), 8), _round_up(B, 8))
    nb = pl.cdiv(B, tb)

    b2 = bias.reshape(1, out_ch)

    x_spec = pl.BlockSpec((tb, in_ch), lambda i: (i, 0))
    w_spec = pl.BlockSpec((out_ch, in_ch), lambda i: (0, 0))   # resident
    b_spec = pl.BlockSpec((1, out_ch), lambda i: (0, 0))       # resident
    o_spec = pl.BlockSpec((tb, out_ch), lambda i: (i, 0))

    cparams = pltpu.CompilerParams(dimension_semantics=("parallel",))
    out_shape = jax.ShapeDtypeStruct((B, out_ch), x.dtype)

    if training and dropout > 0.0:
        if key is None:
            key = jax.random.PRNGKey(0)
        # sum_s mask_s  in {0..S}, folded with the 1/(S*keep_prob) rescale.
        keep = jax.random.bernoulli(key, keep_prob, (num_sample,) + x.shape)
        scale = (keep.sum(axis=0).astype(jnp.float32)
                 * jnp.float32(1.0 / (num_sample * keep_prob))).astype(x.dtype)
        return pl.pallas_call(
            _msd_fc_train_kernel,
            out_shape=out_shape,
            grid=(nb,),
            in_specs=[x_spec,
                      pl.BlockSpec((tb, in_ch), lambda i: (i, 0)),
                      w_spec, b_spec],
            out_specs=o_spec,
            compiler_params=cparams,
        )(x, scale, weight, b2)
    else:
        return pl.pallas_call(
            _msd_fc_eval_kernel,
            out_shape=out_shape,
            grid=(nb,),
            in_specs=[x_spec, w_spec, b_spec],
            out_specs=o_spec,
            compiler_params=cparams,
        )(x, weight, b2)


def fc_reference(x, weight, bias):
    return x @ weight.T + bias


if __name__ == "__main__":
    root = jax.random.PRNGKey(0)
    kx, kw, kb, kd = jax.random.split(root, 4)

    B, in_ch, out_ch = 16, 32, 16
    num_sample, p = 5, 0.5
    keep_prob = 1.0 - p

    x = jax.random.normal(kx, (B, in_ch), dtype=jnp.float32)
    w = jax.random.normal(kw, (out_ch, in_ch), dtype=jnp.float32) * (in_ch ** -0.5)
    b = jax.random.normal(kb, (out_ch,), dtype=jnp.float32)

    ref = fc_reference(x, w, b)

    # 1) eval mode: dropout is identity -> must match fc(x)
    out_eval = multi_sample_dropout_fc(x, w, b, num_sample=num_sample,
                                       dropout=p, training=False)
    out_eval = jax.block_until_ready(out_eval)
    assert out_eval.shape == (B, out_ch), out_eval.shape
    assert out_eval.dtype == x.dtype
    assert jnp.allclose(out_eval, ref, rtol=1e-5, atol=1e-5), "eval mismatch"

    # 2) training with dropout=0: identity dropout -> fc(x)
    out_p0 = multi_sample_dropout_fc(x, w, b, num_sample=num_sample,
                                     dropout=0.0, training=True)
    out_p0 = jax.block_until_ready(out_p0)
    assert jnp.allclose(out_p0, ref, rtol=1e-5, atol=1e-5), "p=0 mismatch"

    # 3) real training run (p=0.5, 5 samples): check against an exact
    #    PyTorch-style reference built from the *same* Bernoulli draws.
    out_train = multi_sample_dropout_fc(x, w, b, key=kd, num_sample=num_sample,
                                        dropout=p, training=True)
    out_train = jax.block_until_ready(out_train)
    assert out_train.shape == (B, out_ch)
    assert out_train.dtype == x.dtype

    keep = jax.random.bernoulli(kd, keep_prob, (num_sample, B, in_ch))
    ref_train = jnp.mean(
        jnp.stack([fc_reference(x * keep[s].astype(x.dtype) / keep_prob, w, b)
                   for s in range(num_sample)], axis=0), axis=0)
    assert bool(jnp.all(jnp.isfinite(out_train)))
    assert jnp.allclose(out_train, ref_train, rtol=1e-4, atol=1e-4), "train mismatch"

    print("KERNEL_OK")
</pallas_src>

<mosaic_0001>
module attributes {stable_mosaic.version = 11 : i64} {
  func.func @_msd_fc_eval_kernel(%arg0: i32, %arg1: memref<16x32xf32, #tpu.memory_space<vmem>>, %arg2: memref<16x32xf32, #tpu.memory_space<vmem>>, %arg3: memref<1x16xf32, #tpu.memory_space<vmem>>, %arg4: memref<16x16xf32, #tpu.memory_space<vmem>>) attributes {dimension_semantics = [#tpu.dimension_semantics<parallel>], iteration_bounds = array<i64: 1>, scalar_prefetch = 0 : i64, scratch_operands = 0 : i64, tpu.core_type = #tpu.core_type<tc>, window_params = [{transform_indices = @transform_0, window_bounds = array<i64: 16, 32>}, {pipeline_mode = #tpu.pipeline_mode<synchronous>, transform_indices = @transform_1, window_bounds = array<i64: 16, 32>}, {pipeline_mode = #tpu.pipeline_mode<synchronous>, transform_indices = @transform_2, window_bounds = array<i64: 1, 16>}, {transform_indices = @transform_3, window_bounds = array<i64: 16, 16>}]} {
    %c0 = arith.constant 0 : index
    %c0_0 = arith.constant 0 : index
    %0 = vector.load %arg1[%c0, %c0_0] : memref<16x32xf32, #tpu.memory_space<vmem>>, vector<16x32xf32>
    %c0_1 = arith.constant 0 : index
    %c0_2 = arith.constant 0 : index
    %1 = vector.load %arg2[%c0_1, %c0_2] : memref<16x32xf32, #tpu.memory_space<vmem>>, vector<16x32xf32>
    %cst = arith.constant dense<0.000000e+00> : vector<16x16xf32>
    %2 = tpu.matmul %0, %1, %cst {dimension_numbers = #tpu.dot_dimension_numbers<[1], [1], [0], [0], [0, 0, 1, 0], [], []>} : vector<16x32xf32>, vector<16x32xf32>, vector<16x16xf32> -> vector<16x16xf32>
    %c0_3 = arith.constant 0 : index
    %c0_4 = arith.constant 0 : index
    %3 = vector.load %arg3[%c0_3, %c0_4] : memref<1x16xf32, #tpu.memory_space<vmem>>, vector<1x16xf32>
    %4 = vector.broadcast %3 : vector<1x16xf32> to vector<16x16xf32>
    %5 = arith.addf %2, %4 : vector<16x16xf32>
    %c0_5 = arith.constant 0 : index
    %c0_6 = arith.constant 0 : index
    %6 = vector.load %arg4[%c0_5, %c0_6] : memref<16x16xf32, #tpu.memory_space<vmem>>, vector<16x16xf32>
    tpu.vector_store %arg4[%c0_5, %c0_6], %5 {strides = array<i32>} : memref<16x16xf32, #tpu.memory_space<vmem>>, vector<16x16xf32>,
    return
  }
  func.func @transform_0(%arg0: i32) -> (i32, i32) {
    %c0_i32 = arith.constant 0 : i32
    %c0_i32_0 = arith.constant 0 : i32
    return %arg0, %c0_i32 : i32, i32
  }
  func.func @transform_1(%arg0: i32) -> (i32, i32) {
    %c0_i32 = arith.constant 0 : i32
    %c0_i32_0 = arith.constant 0 : i32
    %c0_i32_1 = arith.constant 0 : i32
    return %c0_i32, %c0_i32_0 : i32, i32
  }
  func.func @transform_2(%arg0: i32) -> (i32, i32) {
    %c0_i32 = arith.constant 0 : i32
    %c0_i32_0 = arith.constant 0 : i32
    %c0_i32_1 = arith.constant 0 : i32
    return %c0_i32, %c0_i32_0 : i32, i32
  }
  func.func @transform_3(%arg0: i32) -> (i32, i32) {
    %c0_i32 = arith.constant 0 : i32
    %c0_i32_0 = arith.constant 0 : i32
    return %arg0, %c0_i32 : i32, i32
  }
}

</mosaic_0001>

<bundles_post_ra>
// kernel: tpu_custom_call.1
= control target key start
LH: loop header
LB: loop body
LE: loop exit
PB: predicated region body
PF: predicated region fallthrough
CT: control target
= control target key end

     0   :  { %8 = vsyncpa [#allocation3], 0  ;;  %s335_s0 = inlined_call_operand.hbm [shape: f32[16,32], index: 0, kind: input, shape index: {}]   ;;  %s336_s1 = inlined_call_operand.hbm [shape: f32[16,32], index: 1, kind: input, shape index: {}]   ;;  %s337_s2 = inlined_call_operand.vmem [shape: f32[1,16], index: 2, kind: input, shape index: {}]   ;;  %s338_s3 = inlined_call_operand.hbm [shape: f32[16,16], index: 3, kind: output, shape index: {}]  }
   0x1   :  { %9 = vsyncpa [#allocation6], 0 }
   0x2   :  { %10 = vsyncpa [#allocation4], 0  ;;  %s262_s12 = smov [#allocation2]   ;;  %s190_s16 = scalar_lea.hbm %s335_s0, 256 }
   0x3   :  { %s16_s13 = sshll.u32 %s262_s12, 4  ;;  %p191_p0 = scmp.ne.s32.totalorder %s335_s0, %s190_s16  ;;  %s17_s13 = int_to_ptr.vmem [resolvable:$true] %s16_s13 }
   0x4   :  { %p194_p1 = scmp.lt.u32.totalorder %s190_s16, %s335_s0 }
   0x6   :  { %p196_p2 = pnand %p194_p1, %p191_p0 }
   0x8   :  { %199 = shalt.err (!%p196_p2)
}
   0x9   :  { %s200_s21 = scalar_lea.vmem %s17_s13, 256  ;;  %p205_p4 = scmp.lt.s32.totalorder %s17_s13, %s17_s13 }
   0xa   :  { %p201_p3 = scmp.ne.s32.totalorder %s17_s13, %s200_s21  ;;  %p206_p5 = scmp.lt.s32.totalorder %s200_s21, %s200_s21 }
   0xc   :  { %p207_p6 = por %p206_p5, %p205_p4 }
   0xe   :  { %p208_p7 = pnand %p207_p6, %p201_p3 }
  0x10   :  { %211 = shalt.err (!%p208_p7)
}
  0x11   :  { %s263_s22 = smov 128   ;;  %s264_s23 = smov 8  }
  0x12   :  { %22 = dma.hbm_to_vmem [thread:$0]  %s335_s0, 256, %s17_s13, [#allocation3], %s263_s22, %s263_s22, %s264_s23  }
  0x13   :  { %s265_s26 = smov [#allocation5]   ;;  %s212_s30 = scalar_lea.hbm %s336_s1, 256 }
  0x14   :  { %s28_s27 = sshll.u32 %s265_s26, 4  ;;  %p213_p8 = scmp.ne.s32.totalorder %s336_s1, %s212_s30  ;;  %s29_s27 = int_to_ptr.vmem [resolvable:$true] %s28_s27 }
  0x15   :  { %p216_p9 = scmp.lt.u32.totalorder %s212_s30, %s336_s1 }
  0x17   :  { %p218_p10 = pnand %p216_p9, %p213_p8 }
  0x19   :  { %221 = shalt.err (!%p218_p10)
}
  0x1a   :  { %s222_s8 = scalar_lea.vmem %s29_s27, 256  ;;  %p227_p12 = scmp.lt.s32.totalorder %s29_s27, %s29_s27 }
  0x1b   :  { %p223_p11 = scmp.ne.s32.totalorder %s29_s27, %s222_s8  ;;  %p228_p13 = scmp.lt.s32.totalorder %s222_s8, %s222_s8 }
  0x1d   :  { %p229_p0 = por %p228_p13, %p227_p12 }
  0x1f   :  { %p230_p1 = pnand %p229_p0, %p223_p11 }
  0x21   :  { %233 = shalt.err (!%p230_p1)
}
  0x22   :  { %34 = dma.hbm_to_vmem [thread:$0]  %s336_s1, 256, %s29_s27, [#allocation6], %s263_s22, %s263_s22, %s264_s23  }
  0x23   :  { %256 = dma.done.wait [#allocation3], 256  }
  0x24   :  { %257 = vsyncadd [#allocation3], 4294967040 }
  0x25   :  { %258 = dma.done.wait [#allocation6], 256  }
  0x26   :  { %259 = vsyncadd [#allocation6], 4294967040  ;;  %vm54_vm0 = vcmask 261120   ;;  %v45_v0 = vld [vmem:[#allocation5] sm:$0xff]  ;;  %v46_v1 = vld [vmem:[#allocation5 + $0x8] sm:$0xff]  ;;  %s266_s1 = smov [#allocation7]  }
  0x27   :  { %vm180_vm1 = vmpackc.low %vm54_vm0, %vm54_vm0  ;;  %v43_v2 = vld [vmem:[#allocation2] sm:$0xff]  ;;  %v179_v3 = vpack.c.bf16 %v46_v1, %v45_v0  ;;  %v44_v4 = vld [vmem:[#allocation2 + $0x8] sm:$0xff]  ;;  %s150_s12 = sshll.u32 %s266_s1, 4  ;;  %vm142_vm2 = vcmask 130048   ;;  %s151_s12 = int_to_ptr.vmem [resolvable:$true] %s150_s12 }
  0x28   :  { %176 = vmatprep.mubr.msk.f32.mxu0 %vm54_vm0, %v43_v2  ;;  %v163_v5 = vld [vmem:[%s337_s2] ss:$0 sm:$0xff]  ;;  %s234_s13 = scalar_lea.vmem %s151_s12, 256  ;;  %p239_p3 = scmp.lt.s32.totalorder %s151_s12, %s151_s12 }
  0x29   :  { %181 = vmatprep.subr.msk.bf16.mxu0 %vm180_vm1, %v179_v3  ;;  %p235_p2 = scmp.ne.s32.totalorder %s151_s12, %s234_s13  ;;  %p240_p4 = scmp.lt.s32.totalorder %s234_s13, %s234_s13 }
  0x2a   :  { %184 = vmatpush3.bf16.xpose.msk.msra.mxu0 %vm180_vm1, %v179_v3 }
  0x2b   :  { %p241_p5 = por %p240_p4, %p239_p3 }
  0x2d   :  { %p242_p6 = pnand %p241_p5, %p235_p2 }
  0x31   :  { %177 = vmatmul.mubr.msk.f32.vlgmr.msra.gmra.mrb[0].mxu0 %vm54_vm0, %v44_v4 }
 0x104   :  { %v178_v6 = vpop.f32.mrb[0].mxu0 }
 0x105   :  { %v139_v7 = vadd.f32 %v178_v6, %v163_v5  ;;  %v133_v8 = vpop.f32.mrb[1].mxu0 }
 0x106   :  { %v134_v9 = vadd.f32 %v163_v5, %v133_v8 }
 0x107   :  { %144 = vst.msk [vmem:[#allocation7 + $0x8] sm:$0xff] %vm142_vm2, %v139_v7 }
 0x108   :  { %143 = vst.msk [vmem:[#allocation7] sm:$0xff] %vm142_vm2, %v134_v9 }
 0x109   :  { %245 = shalt.err (!%p242_p6)
}
 0x10a   :  { %s246_s2 = scalar_lea.hbm %s338_s3, 256 }
 0x10b   :  { %p247_p7 = scmp.ne.s32.totalorder %s338_s3, %s246_s2  ;;  %p250_p8 = scmp.lt.u32.totalorder %s246_s2, %s338_s3 }
 0x10d   :  { %p252_p9 = pnand %p250_p8, %p247_p7 }
 0x10f   :  { %255 = shalt.err (!%p252_p9)
}
 0x110   :  { %156 = dma.vmem_to_hbm [thread:$0]  %s151_s12, 256, %s338_s3, [#allocation4], %s263_s22, %s263_s22, %s264_s23  }
 0x111   :  { %260 = dma.done.wait [#allocation4], 256  }
 0x112   :  { %261 = vsyncadd [#allocation4], 4294967040 }
 0x113   :  { %160 = vsyncpa [#allocation3], 1 }
 0x114   :  { %161 = vsyncpa [#allocation6], 1 }
 0x115   :  { %162 = vsyncpa [#allocation4], 1 }

</bundles_post_ra>
